<compile_context>
chip_gen: v5e
topology: v5e:2x2
jax: 0.10.0
libtpu: 0.0.40
codegen_flags: <defaults>
</compile_context>

<pallas_src>
import math
from functools import lru_cache, partial

import jax
import jax.numpy as jnp
import numpy as np
from jax import lax
from jax.experimental import pallas as pl
from jax.experimental.pallas import tpu as pltpu

EPS_LN = 1e-5                               # nn.LayerNorm default eps
EPS_BN = 1e-5                               # nn.BatchNorm1d default eps
NEG_INF = -3.4028234663852886e38            # torch.finfo(float32).min (reference only)
MASK_NEG = -1.0e30                          # additive mask bias; never overflows to -inf
BF16 = jnp.bfloat16


# ----------------------------------------------------------------------------- small helpers

def _pick_rows(M):
    """Largest row tile (<=512, multiple of 8) that divides M, else the full M."""
    for c in (512, 256, 128, 64, 32, 16, 8):
        if c <= M and M % c == 0:
            return c
    return M


def _ln(x, g, b):
    mu = jnp.mean(x, axis=-1, keepdims=True)
    var = jnp.mean((x - mu) ** 2, axis=-1, keepdims=True)
    return (x - mu) * lax.rsqrt(var + EPS_LN) * g + b


@lru_cache(maxsize=None)
def _vmem_limit_bytes():
    """Per-generation scoped-VMEM budget (~85% of physical, conservative fallback)."""
    try:
        cap = int(pltpu.get_tpu_info().vmem_capacity_bytes)
    except Exception:
        cap = 0
    if cap <= 0:
        return 48 * 1024 * 1024              # safe on every generation (v7x has 64 MiB)
    return min(int(cap * 0.85), 112 * 1024 * 1024)


@lru_cache(maxsize=None)
def _single_buffer_ok():
    """Probe whether pipeline_mode=pl.Buffered(1) works for constant-index blocks."""
    try:
        def kern(x_ref, w_ref, o_ref):
            o_ref[...] = x_ref[...] + w_ref[...]
        x = jnp.arange(16 * 128, dtype=jnp.float32).reshape(16, 128)
        w = jnp.ones((8, 128), jnp.float32)
        out = pl.pallas_call(
            kern,
            out_shape=jax.ShapeDtypeStruct((16, 128), jnp.float32),
            grid=(2,),
            in_specs=[pl.BlockSpec((8, 128), lambda i: (i, 0)),
                      pl.BlockSpec((8, 128), lambda i: (0, 0),
                                   pipeline_mode=pl.Buffered(1))],
            out_specs=pl.BlockSpec((8, 128), lambda i: (i, 0)),
        )(x, w)
        return bool(np.allclose(np.asarray(out), np.asarray(x) + 1.0))
    except Exception:
        return False


def _const_spec(shape, single_buffer=False):
    """BlockSpec for a block whose index map is constant across the grid (weights)."""
    zeros = (0,) * len(shape)
    if single_buffer and _single_buffer_ok():
        return pl.BlockSpec(shape, lambda *_: zeros, pipeline_mode=pl.Buffered(1))
    return pl.BlockSpec(shape, lambda *_: zeros)


# ----------------------------------------------------------------------------- rel_shift

def _rel_shift_barrel(bd, T):
    """Known-correct fallback: log2(2T)-stage barrel shifter of per-row rotations.

    bd: (T, 2T); returns (T, T) with out[t, s] = bd[t, T-1-t+s].
    """
    if T <= 1:
        return bd[:, :T]
    rot = (T - 1) - lax.broadcasted_iota(jnp.int32, (T, 1), 0)   # left-rotate amount per row
    x = bd
    for bit in range((T - 1).bit_length()):
        amt = 1 << bit
        rolled = jnp.concatenate([x[:, amt:], x[:, :amt]], axis=1)
        x = jnp.where((rot & amt) != 0, rolled, x)
    return x[:, :T]


def _rel_shift_roll(bd, T, shift, stride):
    """Single strided XLU rotate along lanes; the last query row is corrected with a
    select (its rotate amount can wrap to the full lane width for some candidates)."""
    rolled = pltpu.roll(bd, shift, 1, stride=stride, stride_axis=0)
    row = lax.broadcasted_iota(jnp.int32, (T, 1), 0)
    return jnp.where(row == T - 1, bd[:, :T], rolled[:, :T])


@lru_cache(maxsize=None)
def _rel_shift_impl(T):
    """Choose a rel-shift implementation for (static) sequence length T.

    On lane-aligned production shapes (2T % 128 == 0, T % 8 == 0) a strided
    pltpu.roll candidate is probed on this backend (matmul-produced scores, exact
    integer data) and used only if it verifies; otherwise, and for sub-tile toy
    shapes, the barrel shifter is used.
    """
    if T <= 1:
        return lambda bd: bd[:, :T]
    if (2 * T) % 128 == 0 and T % 8 == 0:
        dk = 8
        rng = np.random.default_rng(0)
        a_np = rng.integers(-4, 5, size=(T, dk)).astype(np.float32)
        b_np = rng.integers(-4, 5, size=(2 * T, dk)).astype(np.float32)
        bd_np = a_np @ b_np.T
        want = np.stack([bd_np[t, T - 1 - t: 2 * T - 1 - t] for t in range(T)])
        for shift, stride in ((T - 1, -1), (T + 1, 1), (1 - T, 1)):
            def kern(a_ref, b_ref, o_ref, _s=shift, _st=stride):
                bd = lax.dot_general(a_ref[...], b_ref[...],
                                     (((1,), (1,)), ((), ())),
                                     preferred_element_type=jnp.float32)
                o_ref[...] = _rel_shift_roll(bd, T, _s, _st)
            try:
                got = np.asarray(pl.pallas_call(
                    kern, out_shape=jax.ShapeDtypeStruct((T, T), jnp.float32),
                )(jnp.asarray(a_np), jnp.asarray(b_np)))
            except Exception:
                continue
            if np.allclose(got, want, rtol=1e-5, atol=1e-5):
                return partial(_rel_shift_roll, T=T, shift=shift, stride=stride)
    return partial(_rel_shift_barrel, T=T)


# ----------------------------------------------------------------------------- positional projection

def _pos_proj_kernel(p_ref, w_ref, o_ref):
    # p @ wp (no bias), emitted directly in bf16 (it is only ever consumed as bf16).
    o_ref[...] = jnp.dot(p_ref[...].astype(BF16), w_ref[...],
                         preferred_element_type=jnp.float32).astype(BF16)


def project_pos(pos, wp):
    M, D = pos.shape
    N = wp.shape[1]
    rt = _pick_rows(M)
    return pl.pallas_call(
        _pos_proj_kernel,
        out_shape=jax.ShapeDtypeStruct((M, N), BF16),
        grid=(M // rt,),
        in_specs=[pl.BlockSpec((rt, D), lambda i: (i, 0)),
                  _const_spec((D, N), single_buffer=True)],
        out_specs=pl.BlockSpec((rt, N), lambda i: (i, 0)),
        compiler_params=pltpu.CompilerParams(
            dimension_semantics=("parallel",), vmem_limit_bytes=_vmem_limit_bytes()),
    )(pos, wp.astype(BF16))


# ----------------------------------------------------------------------------- feed-forward module

def _ffn_kernel(x_ref, g_ref, bt_ref, w1_ref, b1_ref, w2_ref, b2_ref,
                gf_ref, bf_ref, o_ref, *, scale, final_ln):
    # Fused: residual + scale * Linear(Swish(Linear(LayerNorm(x))))  [+ final LayerNorm]
    x = x_ref[...]
    xn = _ln(x, g_ref[...], bt_ref[...]).astype(BF16)
    h = jnp.dot(xn, w1_ref[...], preferred_element_type=jnp.float32) + b1_ref[...]
    h = h * jax.nn.sigmoid(h)                                   # Swish
    y = jnp.dot(h.astype(BF16), w2_ref[...],
                preferred_element_type=jnp.float32) + b2_ref[...]
    out = x + scale * y
    if final_ln:
        out = _ln(out, gf_ref[...], bf_ref[...])
    o_ref[...] = out


def feed_forward(x, p, scale, final_g=None, final_b=None, alias_input=True):
    M, D = x.shape
    Dh = p["w1"].shape[1]
    rt = _pick_rows(M)
    final_ln = final_g is not None
    if final_g is None:                                          # unread dummies
        final_g, final_b = p["ln_g"], p["ln_b"]
    return pl.pallas_call(
        partial(_ffn_kernel, scale=scale, final_ln=final_ln),
        out_shape=jax.ShapeDtypeStruct((M, D), jnp.float32),
        grid=(M // rt,),
        in_specs=[pl.BlockSpec((rt, D), lambda i: (i, 0)),
                  _const_spec((1, D)), _const_spec((1, D)),
                  _const_spec((D, Dh), single_buffer=True), _const_spec((1, Dh)),
                  _const_spec((Dh, D), single_buffer=True), _const_spec((1, D)),
                  _const_spec((1, D)), _const_spec((1, D))],
        out_specs=pl.BlockSpec((rt, D), lambda i: (i, 0)),
        input_output_aliases=({0: 0} if alias_input else {}),
        compiler_params=pltpu.CompilerParams(
            dimension_semantics=("parallel",), vmem_limit_bytes=_vmem_limit_bytes()),
    )(x, p["ln_g"], p["ln_b"], p["w1"].astype(BF16), p["b1"],
      p["w2"].astype(BF16), p["b2"], final_g, final_b)


# ----------------------------------------------------------------------------- fused MHSA + conv module

def _attn_conv_kernel(x_ref, gmh_ref, bmh_ref, wqkv_ref, bqkv_ref, bu_ref, bv_ref,
                      p_ref, m_ref, wo_ref, bo_ref,
                      gcv_ref, bcv_ref, w1_ref, b1_ref, wdw_ref, bdw_ref,
                      bng_ref, bnb_ref, bnm_ref, bnv_ref, w2_ref, b2_ref,
                      o_ref, ctx_ref, *, H, dk, scale, K, rel_shift):
    x = x_ref[0]                                                 # (T, D) f32
    T = x.shape[0]
    D = H * dk

    # ---------------- rel-pos MHSA + residual ----------------
    xn = _ln(x, gmh_ref[...], bmh_ref[...]).astype(BF16)
    qkv = jnp.dot(xn, wqkv_ref[...],
                  preferred_element_type=jnp.float32) + bqkv_ref[...]      # (T, 3D)
    q = qkv[:, :D]
    k = qkv[:, D:2 * D].astype(BF16)
    v = qkv[:, 2 * D:].astype(BF16)
    # fold 1/sqrt(dk) into q once ((T,D) mul) instead of scaling H (T,T) score tiles
    qu = ((q + bu_ref[...]) * scale).astype(BF16)                # + pos_bias_u
    qv = ((q + bv_ref[...]) * scale).astype(BF16)                # + pos_bias_v
    pe = p_ref[...]                                              # (2T, D) bf16

    # hoist mask work out of the per-head loop (JAX does not CSE broadcasts)
    keep = m_ref[0] > 0.0                                        # (1, T)
    bias_tt = jnp.broadcast_to(jnp.where(keep, 0.0, MASK_NEG), (T, T))
    keep_tt = jnp.broadcast_to(keep.astype(jnp.float32), (T, T))
    dn = (((1,), (1,)), ((), ()))

    for h in range(H):                                           # static head loop
        cs = slice(h * dk, (h + 1) * dk)
        ac = lax.dot_general(qu[:, cs], k[:, cs], dn,
                             preferred_element_type=jnp.float32)            # (T, T)
        bd = lax.dot_general(qv[:, cs], pe[:, cs], dn,
                             preferred_element_type=jnp.float32)            # (T, 2T)
        s = ac + rel_shift(bd) + bias_tt
        e = jnp.exp(s - jnp.max(s, axis=-1, keepdims=True))
        attn = e * pl.reciprocal(jnp.sum(e, axis=-1, keepdims=True), approx=True)
        attn = (attn * keep_tt).astype(BF16)
        # per-head context goes straight into a VMEM scratch (no head concat/relayout)
        ctx_ref[:, cs] = jnp.dot(attn, v[:, cs],
                                 preferred_element_type=jnp.float32).astype(BF16)
    y = jnp.dot(ctx_ref[...], wo_ref[...],
                preferred_element_type=jnp.float32) + bo_ref[...]
    xa = x + y                                                   # residual after attention

    # ---------------- convolution module + residual ----------------
    cn = _ln(xa, gcv_ref[...], bcv_ref[...]).astype(BF16)
    hg = jnp.dot(cn, w1_ref[...], preferred_element_type=jnp.float32) + b1_ref[...]  # (T, 2D)
    u = hg[:, :D] * jax.nn.sigmoid(hg[:, D:])                    # GLU
    pad = (K - 1) // 2
    zp = jnp.zeros((pad, D), jnp.float32)
    up = jnp.concatenate([zp, u, zp], axis=0)                    # zero-pad time axis
    # TODO(synk): for long T, tile the time axis with a (K-1)/2 halo and use XLU
    #             rolls per tap instead of sublane-misaligned slices.
    parts = [jnp.zeros((T, D), jnp.float32) for _ in range(4)]   # break serial add chain
    for kk in range(K):                                          # depthwise conv
        parts[kk % 4] = parts[kk % 4] + up[kk:kk + T, :] * wdw_ref[kk]
    acc = (parts[0] + parts[1]) + (parts[2] + parts[3]) + bdw_ref[...]
    bn = (acc - bnm_ref[...]) * lax.rsqrt(bnv_ref[...] + EPS_BN) * bng_ref[...] + bnb_ref[...]
    bn = bn * jax.nn.sigmoid(bn)                                 # Swish
    y2 = jnp.dot(bn.astype(BF16), w2_ref[...],
                 preferred_element_type=jnp.float32) + b2_ref[...]
    o_ref[0] = xa + y2                                           # residual add


def attn_conv(x, p_proj, mask_f, params):
    B, T, D = x.shape
    H = params["num_heads"]
    dk = D // H
    K = params["conv_kernel_size"]
    P2 = p_proj.shape[0]                                         # 2T (padded)
    wqkv = jnp.concatenate([params["wq"], params["wk"], params["wv"]], axis=1).astype(BF16)
    bqkv = jnp.concatenate([params["bq"], params["bk"], params["bv"]], axis=1)
    bu = params["pos_bias_u"].reshape(1, D)
    bv = params["pos_bias_v"].reshape(1, D)
    w1 = jnp.concatenate([params["conv_w1a"], params["conv_w1b"]], axis=1).astype(BF16)
    b1 = jnp.concatenate([params["conv_b1a"], params["conv_b1b"]], axis=1)
    rel_shift = _rel_shift_impl(T)
    kernel = partial(_attn_conv_kernel, H=H, dk=dk, scale=1.0 / math.sqrt(dk),
                     K=K, rel_shift=rel_shift)
    return pl.pallas_call(
        kernel,
        out_shape=jax.ShapeDtypeStruct((B, T, D), jnp.float32),
        grid=(B,),
        in_specs=[pl.BlockSpec((1, T, D), lambda b: (b, 0, 0)),
                  _const_spec((1, D)), _const_spec((1, D)),
                  _const_spec((D, 3 * D), single_buffer=True), _const_spec((1, 3 * D)),
                  _const_spec((1, D)), _const_spec((1, D)),
                  _const_spec((P2, D), single_buffer=True),
                  pl.BlockSpec((1, 1, T), lambda b: (b, 0, 0)),
                  _const_spec((D, D), single_buffer=True), _const_spec((1, D)),
                  _const_spec((1, D)), _const_spec((1, D)),
                  _const_spec((D, 2 * D), single_buffer=True), _const_spec((1, 2 * D)),
                  _const_spec((K, 1, D)), _const_spec((1, D)),
                  _const_spec((1, D)), _const_spec((1, D)),
                  _const_spec((1, D)), _const_spec((1, D)),
                  _const_spec((D, D), single_buffer=True), _const_spec((1, D))],
        out_specs=pl.BlockSpec((1, T, D), lambda b: (b, 0, 0)),
        scratch_shapes=[pltpu.VMEM((T, D), BF16)],
        input_output_aliases={0: 0},
        compiler_params=pltpu.CompilerParams(
            dimension_semantics=("parallel",), vmem_limit_bytes=_vmem_limit_bytes()),
    )(x, params["ln_mha_g"], params["ln_mha_b"], wqkv, bqkv, bu, bv,
      p_proj, mask_f, params["wo"].astype(BF16), params["bo"],
      params["ln_conv_g"], params["ln_conv_b"], w1, b1,
      params["conv_wdw"], params["conv_bdw"],
      params["bn_g"], params["bn_b"], params["bn_m"], params["bn_v"],
      params["conv_w2"].astype(BF16), params["conv_b2"])


# ----------------------------------------------------------------------------- forward (glue)

def conformer_block_forward(x, pos_emb, mask, params):
    B, T, D = x.shape
    mask_f = mask.astype(jnp.float32)                               # (B, 1, T)

    # 1) x = x + 0.5 * FF1(x)              (LN fused; not aliased: x reused by caller)
    x2 = feed_forward(x.reshape(B * T, D), params["f1"], params["ff_scale"],
                      alias_input=False)

    # 2+3) rel-pos MHSA + convolution module, fused into one kernel per batch element
    pos = pos_emb.reshape(-1, D)                                    # (2T-1, D)
    pos = jnp.concatenate([pos, jnp.zeros((1, D), pos.dtype)], axis=0)   # pad -> (2T, D)
    p_proj = project_pos(pos, params["wp"])                         # bf16 (2T, D)
    x3 = attn_conv(x2.reshape(B, T, D), p_proj, mask_f, params)

    # 4) x = x + 0.5 * FF2(x)  and  5) final LayerNorm  (fused into one kernel)
    x4 = feed_forward(x3.reshape(B * T, D), params["f2"], params["ff_scale"],
                      final_g=params["ln_final_g"], final_b=params["ln_final_b"],
                      alias_input=True)
    return (x4.reshape(B, T, D), pos_emb), mask


# ----------------------------------------------------------------------------- pure-JAX (f32) reference

def rel_shift(x):
    B, H, T, P = x.shape
    zero_pad = jnp.zeros((B, H, T, 1), x.dtype)
    xp = jnp.concatenate([zero_pad, x], axis=-1).reshape(B, H, P + 1, T)
    x = xp[:, :, 1:, :].reshape(B, H, T, P)
    return x[..., : P // 2 + 1]


def _ln_ref(x, g, b):
    mu = jnp.mean(x, -1, keepdims=True)
    var = jnp.mean((x - mu) ** 2, -1, keepdims=True)
    return (x - mu) * lax.rsqrt(var + EPS_LN) * g + b


def _ffn_ref(x, p, scale):
    xn = _ln_ref(x, p["ln_g"], p["ln_b"])
    h = xn @ p["w1"] + p["b1"]
    h = h * jax.nn.sigmoid(h)
    return x + scale * (h @ p["w2"] + p["b2"])


def _conv_ref(xn, params):
    B, T, D = xn.shape
    K = params["conv_kernel_size"]
    pad = (K - 1) // 2
    a = xn @ params["conv_w1a"] + params["conv_b1a"]
    g = xn @ params["conv_w1b"] + params["conv_b1b"]
    u = a * jax.nn.sigmoid(g)
    up = jnp.pad(u, ((0, 0), (pad, pad), (0, 0)))
    wdw = params["conv_wdw"][:, 0, :]
    acc = jnp.zeros_like(u)
    for k in range(K):
        acc = acc + up[:, k:k + T, :] * wdw[k][None, None, :]
    acc = acc + params["conv_bdw"]
    bn = (acc - params["bn_m"]) * lax.rsqrt(params["bn_v"] + EPS_BN) * params["bn_g"] + params["bn_b"]
    bn = bn * jax.nn.sigmoid(bn)
    return bn @ params["conv_w2"] + params["conv_b2"]


def reference_forward(x, pos_emb, mask, params):
    B, T, D = x.shape
    H = params["num_heads"]
    dk = D // H
    x = _ffn_ref(x, params["f1"], params["ff_scale"])
    residual = x
    xn = _ln_ref(x, params["ln_mha_g"], params["ln_mha_b"])
    q = xn @ params["wq"] + params["bq"]
    k = xn @ params["wk"] + params["bk"]
    v = xn @ params["wv"] + params["bv"]
    p = pos_emb @ params["wp"]
    q = q.reshape(B, T, H, dk)
    k = k.reshape(B, T, H, dk).transpose(0, 2, 1, 3)
    v = v.reshape(B, T, H, dk).transpose(0, 2, 1, 3)
    p = p.reshape(1, -1, H, dk).transpose(0, 2, 1, 3)
    bu = params["pos_bias_u"][:, 0, :]
    bv = params["pos_bias_v"][:, 0, :]
    qu = (q + bu).transpose(0, 2, 1, 3)
    qv = (q + bv).transpose(0, 2, 1, 3)
    ac = jnp.einsum("bhtd,bhsd->bhts", qu, k)
    bd = rel_shift(jnp.einsum("bhtd,bhpd->bhtp", qv, p))
    scores = (ac + bd) / math.sqrt(dk)
    keep = mask.astype(jnp.float32).reshape(B, 1, 1, T) > 0
    scores = jnp.where(keep, scores, NEG_INF)
    attn = jax.nn.softmax(scores, axis=-1)
    attn = jnp.where(keep, attn, 0.0)
    ctx = jnp.einsum("bhts,bhsd->bhtd", attn, v).transpose(0, 2, 1, 3).reshape(B, T, D)
    x = residual + (ctx @ params["wo"] + params["bo"])
    residual = x
    xn = _ln_ref(x, params["ln_conv_g"], params["ln_conv_b"])
    x = residual + _conv_ref(xn, params)
    x = _ffn_ref(x, params["f2"], params["ff_scale"])
    return _ln_ref(x, params["ln_final_g"], params["ln_final_b"])


# ----------------------------------------------------------------------------- params

def init_params(key, D, H, ff_mult, K, ff_scale):
    dk = D // H
    Dh = D * ff_mult
    keys = iter(jax.random.split(key, 40))

    def rnd(shape, s=0.08):
        return (jax.random.normal(next(keys), shape) * s).astype(jnp.float32)

    ones = lambda shape: jnp.ones(shape, jnp.float32)
    zeros = lambda shape: jnp.zeros(shape, jnp.float32)

    def ffn_p():
        return {"ln_g": ones((1, D)), "ln_b": zeros((1, D)),
                "w1": rnd((D, Dh)), "b1": rnd((1, Dh)),
                "w2": rnd((Dh, D)), "b2": rnd((1, D))}

    return {
        "num_heads": H, "ff_scale": ff_scale, "conv_kernel_size": K,
        "f1": ffn_p(), "f2": ffn_p(),
        "ln_mha_g": ones((1, D)), "ln_mha_b": zeros((1, D)),
        "wq": rnd((D, D)), "bq": rnd((1, D)),
        "wk": rnd((D, D)), "bk": rnd((1, D)),
        "wv": rnd((D, D)), "bv": rnd((1, D)),
        "wo": rnd((D, D)), "bo": rnd((1, D)),
        "wp": rnd((D, D)),
        "pos_bias_u": rnd((H, 1, dk)), "pos_bias_v": rnd((H, 1, dk)),
        "ln_conv_g": ones((1, D)), "ln_conv_b": zeros((1, D)),
        "conv_w1a": rnd((D, D)), "conv_b1a": rnd((1, D)),
        "conv_w1b": rnd((D, D)), "conv_b1b": rnd((1, D)),
        "conv_wdw": rnd((K, 1, D)), "conv_bdw": rnd((1, D)),
        "bn_g": ones((1, D)), "bn_b": zeros((1, D)),
        "bn_m": zeros((1, D)), "bn_v": ones((1, D)),
        "conv_w2": rnd((D, D)), "conv_b2": rnd((1, D)),
        "ln_final_g": ones((1, D)), "ln_final_b": zeros((1, D)),
    }


# ----------------------------------------------------------------------------- main

if __name__ == "__main__":
    B, T, D, H = 2, 8, 32, 4
    FF_MULT, K = 4, 31

    key = jax.random.PRNGKey(0)
    k_x, k_pos, k_p = jax.random.split(key, 3)
    x = jax.random.normal(k_x, (B, T, D), jnp.float32)
    pos_emb = jax.random.normal(k_pos, (1, 2 * T - 1, D), jnp.float32)   # rel-pos embedding
    mask = jnp.ones((B, 1, T), jnp.int32).at[1, 0, T - 2:].set(0)        # (batch, 1, time)

    params = init_params(k_p, D, H, FF_MULT, K, ff_scale=0.5)

    (out, pos_out), mask_out = conformer_block_forward(x, pos_emb, mask, params)
    out = jax.block_until_ready(out)

    ref = reference_forward(x, pos_emb, mask, params)
    # bf16 MXU operands (f32 accumulation) vs the pure-f32 reference.
    np.testing.assert_allclose(np.asarray(out), np.asarray(ref), rtol=5e-2, atol=5e-2)

    print("KERNEL_OK")
</pallas_src>

<mosaic_0001>
module attributes {stable_mosaic.version = 11 : i64} {
  func.func @kern(%arg0: i32, %arg1: memref<8x128xf32, #tpu.memory_space<vmem>>, %arg2: memref<8x128xf32, #tpu.memory_space<vmem>>, %arg3: memref<8x128xf32, #tpu.memory_space<vmem>>) attributes {dimension_semantics = [#tpu.dimension_semantics<arbitrary>], iteration_bounds = array<i64: 2>, scalar_prefetch = 0 : i64, scratch_operands = 0 : i64, tpu.core_type = #tpu.core_type<tc>, window_params = [{transform_indices = @transform_0, window_bounds = array<i64: 8, 128>}, {pipeline_mode = #tpu.pipeline_mode<synchronous>, transform_indices = @transform_1, window_bounds = array<i64: 8, 128>}, {transform_indices = @transform_2, window_bounds = array<i64: 8, 128>}]} {
    %c0 = arith.constant 0 : index
    %c0_0 = arith.constant 0 : index
    %0 = vector.load %arg1[%c0, %c0_0] : memref<8x128xf32, #tpu.memory_space<vmem>>, vector<8x128xf32>
    %c0_1 = arith.constant 0 : index
    %c0_2 = arith.constant 0 : index
    %1 = vector.load %arg2[%c0_1, %c0_2] : memref<8x128xf32, #tpu.memory_space<vmem>>, vector<8x128xf32>
    %2 = arith.addf %0, %1 : vector<8x128xf32>
    %c0_3 = arith.constant 0 : index
    %c0_4 = arith.constant 0 : index
    %3 = vector.load %arg3[%c0_3, %c0_4] : memref<8x128xf32, #tpu.memory_space<vmem>>, vector<8x128xf32>
    tpu.vector_store %arg3[%c0_3, %c0_4], %2 {strides = array<i32>} : memref<8x128xf32, #tpu.memory_space<vmem>>, vector<8x128xf32>,
    return
  }
  func.func @transform_0(%arg0: i32) -> (i32, i32) {
    %c0_i32 = arith.constant 0 : i32
    %c0_i32_0 = arith.constant 0 : i32
    return %arg0, %c0_i32 : i32, i32
  }
  func.func @transform_1(%arg0: i32) -> (i32, i32) {
    %c0_i32 = arith.constant 0 : i32
    %c0_i32_0 = arith.constant 0 : i32
    %c0_i32_1 = arith.constant 0 : i32
    return %c0_i32, %c0_i32_0 : i32, i32
  }
  func.func @transform_2(%arg0: i32) -> (i32, i32) {
    %c0_i32 = arith.constant 0 : i32
    %c0_i32_0 = arith.constant 0 : i32
    return %arg0, %c0_i32 : i32, i32
  }
}

module attributes {stable_mosaic.version = 11 : i64} {
  func.func @_ffn_kernel(%arg0: i32, %arg1: memref<16x32xf32, #tpu.memory_space<vmem>>, %arg2: memref<1x32xf32, #tpu.memory_space<vmem>>, %arg3: memref<1x32xf32, #tpu.memory_space<vmem>>, %arg4: memref<32x128xbf16, #tpu.memory_space<vmem>>, %arg5: memref<1x128xf32, #tpu.memory_space<vmem>>, %arg6: memref<128x32xbf16, #tpu.memory_space<vmem>>, %arg7: memref<1x32xf32, #tpu.memory_space<vmem>>, %arg8: memref<1x32xf32, #tpu.memory_space<vmem>>, %arg9: memref<1x32xf32, #tpu.memory_space<vmem>>, %arg10: memref<16x32xf32, #tpu.memory_space<vmem>>) attributes {dimension_semantics = [#tpu.dimension_semantics<parallel>], iteration_bounds = array<i64: 1>, scalar_prefetch = 0 : i64, scratch_operands = 0 : i64, tpu.core_type = #tpu.core_type<tc>, window_params = [{transform_indices = @transform_0, window_bounds = array<i64: 16, 32>}, {pipeline_mode = #tpu.pipeline_mode<synchronous>, transform_indices = @transform_1, window_bounds = array<i64: 1, 32>}, {pipeline_mode = #tpu.pipeline_mode<synchronous>, transform_indices = @transform_2, window_bounds = array<i64: 1, 32>}, {pipeline_mode = #tpu.pipeline_mode<synchronous>, transform_indices = @transform_3, window_bounds = array<i64: 32, 128>}, {pipeline_mode = #tpu.pipeline_mode<synchronous>, transform_indices = @transform_4, window_bounds = array<i64: 1, 128>}, {pipeline_mode = #tpu.pipeline_mode<synchronous>, transform_indices = @transform_5, window_bounds = array<i64: 128, 32>}, {pipeline_mode = #tpu.pipeline_mode<synchronous>, transform_indices = @transform_6, window_bounds = array<i64: 1, 32>}, {pipeline_mode = #tpu.pipeline_mode<synchronous>, transform_indices = @transform_7, window_bounds = array<i64: 1, 32>}, {pipeline_mode = #tpu.pipeline_mode<synchronous>, transform_indices = @transform_8, window_bounds = array<i64: 1, 32>}, {transform_indices = @transform_9, window_bounds = array<i64: 16, 32>}]} {
    %c0 = arith.constant 0 : index
    %c0_0 = arith.constant 0 : index
    %0 = vector.load %arg1[%c0, %c0_0] : memref<16x32xf32, #tpu.memory_space<vmem>>, vector<16x32xf32>
    %c0_1 = arith.constant 0 : index
    %c0_2 = arith.constant 0 : index
    %1 = vector.load %arg2[%c0_1, %c0_2] : memref<1x32xf32, #tpu.memory_space<vmem>>, vector<1x32xf32>
    %c0_3 = arith.constant 0 : index
    %c0_4 = arith.constant 0 : index
    %2 = vector.load %arg3[%c0_3, %c0_4] : memref<1x32xf32, #tpu.memory_space<vmem>>, vector<1x32xf32>
    %cst = arith.constant dense<0.000000e+00> : vector<16xf32>
    %3 = vector.multi_reduction <add>, %0, %cst [1] : vector<16x32xf32> to vector<16xf32>
    %4 = vector.shape_cast %3 : vector<16xf32> to vector<16x1xf32>
    %cst_5 = arith.constant 3.200000e+01 : f32
    %5 = vector.broadcast %cst_5 : f32 to vector<16x1xf32>
    %6 = arith.divf %4, %5 : vector<16x1xf32>
    %7 = vector.broadcast %6 : vector<16x1xf32> to vector<16x32xf32>
    %8 = arith.subf %0, %7 : vector<16x32xf32>
    %9 = arith.mulf %8, %8 : vector<16x32xf32>
    %cst_6 = arith.constant dense<0.000000e+00> : vector<16xf32>
    %10 = vector.multi_reduction <add>, %9, %cst_6 [1] : vector<16x32xf32> to vector<16xf32>
    %11 = vector.shape_cast %10 : vector<16xf32> to vector<16x1xf32>
    %cst_7 = arith.constant 3.200000e+01 : f32
    %12 = vector.broadcast %cst_7 : f32 to vector<16x1xf32>
    %13 = arith.divf %11, %12 : vector<16x1xf32>
    %14 = vector.broadcast %6 : vector<16x1xf32> to vector<16x32xf32>
    %15 = arith.subf %0, %14 : vector<16x32xf32>
    %cst_8 = arith.constant 9.99999974E-6 : f32
    %16 = vector.broadcast %cst_8 : f32 to vector<16x1xf32>
    %17 = arith.addf %13, %16 : vector<16x1xf32>
    %18 = math.rsqrt %17 : vector<16x1xf32>
    %19 = vector.broadcast %18 : vector<16x1xf32> to vector<16x32xf32>
    %20 = arith.mulf %15, %19 : vector<16x32xf32>
    %21 = vector.broadcast %1 : vector<1x32xf32> to vector<16x32xf32>
    %22 = arith.mulf %20, %21 : vector<16x32xf32>
    %23 = vector.broadcast %2 : vector<1x32xf32> to vector<16x32xf32>
    %24 = arith.addf %22, %23 : vector<16x32xf32>
    %25 = arith.truncf %24 : vector<16x32xf32> to vector<16x32xbf16>
    %c0_9 = arith.constant 0 : index
    %c0_10 = arith.constant 0 : index
    %26 = vector.load %arg4[%c0_9, %c0_10] : memref<32x128xbf16, #tpu.memory_space<vmem>>, vector<32x128xbf16>
    %cst_11 = arith.constant dense<0.000000e+00> : vector<16x128xf32>
    %27 = tpu.matmul %25, %26, %cst_11 {dimension_numbers = #tpu.dot_dimension_numbers<[1], [0], [0], [1], [0, 0, 1, 1], [], []>} : vector<16x32xbf16>, vector<32x128xbf16>, vector<16x128xf32> -> vector<16x128xf32>
    %c0_12 = arith.constant 0 : index
    %c0_13 = arith.constant 0 : index
    %28 = vector.load %arg5[%c0_12, %c0_13] : memref<1x128xf32, #tpu.memory_space<vmem>>, vector<1x128xf32>
    %29 = vector.broadcast %28 : vector<1x128xf32> to vector<16x128xf32>
    %30 = arith.addf %27, %29 : vector<16x128xf32>
    %31 = arith.negf %30 : vector<16x128xf32>
    %32 = math.exp %31 : vector<16x128xf32>
    %cst_14 = arith.constant 1.000000e+00 : f32
    %33 = vector.broadcast %cst_14 : f32 to vector<16x128xf32>
    %34 = arith.addf %33, %32 : vector<16x128xf32>
    %35 = arith.divf %33, %34 : vector<16x128xf32>
    %36 = arith.mulf %30, %35 : vector<16x128xf32>
    %37 = arith.truncf %36 : vector<16x128xf32> to vector<16x128xbf16>
    %c0_15 = arith.constant 0 : index
    %c0_16 = arith.constant 0 : index
    %38 = vector.load %arg6[%c0_15, %c0_16] : memref<128x32xbf16, #tpu.memory_space<vmem>>, vector<128x32xbf16>
    %cst_17 = arith.constant dense<0.000000e+00> : vector<16x32xf32>
    %39 = tpu.matmul %37, %38, %cst_17 {dimension_numbers = #tpu.dot_dimension_numbers<[1], [0], [0], [1], [0, 0, 1, 1], [], []>} : vector<16x128xbf16>, vector<128x32xbf16>, vector<16x32xf32> -> vector<16x32xf32>
    %c0_18 = arith.constant 0 : index
    %c0_19 = arith.constant 0 : index
    %40 = vector.load %arg7[%c0_18, %c0_19] : memref<1x32xf32, #tpu.memory_space<vmem>>, vector<1x32xf32>
    %41 = vector.broadcast %40 : vector<1x32xf32> to vector<16x32xf32>
    %42 = arith.addf %39, %41 : vector<16x32xf32>
    %cst_20 = arith.constant 5.000000e-01 : f32
    %43 = vector.broadcast %cst_20 : f32 to vector<16x32xf32>
    %44 = arith.mulf %43, %42 : vector<16x32xf32>
    %45 = arith.addf %0, %44 : vector<16x32xf32>
    %c0_21 = arith.constant 0 : index
    %c0_22 = arith.constant 0 : index
    %46 = vector.load %arg10[%c0_21, %c0_22] : memref<16x32xf32, #tpu.memory_space<vmem>>, vector<16x32xf32>
    tpu.vector_store %arg10[%c0_21, %c0_22], %45 {strides = array<i32>} : memref<16x32xf32, #tpu.memory_space<vmem>>, vector<16x32xf32>,
    return
  }
  func.func @transform_0(%arg0: i32) -> (i32, i32) {
    %c0_i32 = arith.constant 0 : i32
    %c0_i32_0 = arith.constant 0 : i32
    return %arg0, %c0_i32 : i32, i32
  }
  func.func @transform_1(%arg0: i32) -> (i32, i32) {
    %c0_i32 = arith.constant 0 : i32
    %c0_i32_0 = arith.constant 0 : i32
    %c0_i32_1 = arith.constant 0 : i32
    return %c0_i32, %c0_i32_0 : i32, i32
  }
  func.func @transform_2(%arg0: i32) -> (i32, i32) {
    %c0_i32 = arith.constant 0 : i32
    %c0_i32_0 = arith.constant 0 : i32
    %c0_i32_1 = arith.constant 0 : i32
    return %c0_i32, %c0_i32_0 : i32, i32
  }
  func.func @transform_3(%arg0: i32) -> (i32, i32) {
    %c0_i32 = arith.constant 0 : i32
    %c0_i32_0 = arith.constant 0 : i32
    %c0_i32_1 = arith.constant 0 : i32
    return %c0_i32, %c0_i32_0 : i32, i32
  }
  func.func @transform_4(%arg0: i32) -> (i32, i32) {
    %c0_i32 = arith.constant 0 : i32
    %c0_i32_0 = arith.constant 0 : i32
    %c0_i32_1 = arith.constant 0 : i32
    return %c0_i32, %c0_i32_0 : i32, i32
  }
  func.func @transform_5(%arg0: i32) -> (i32, i32) {
    %c0_i32 = arith.constant 0 : i32
    %c0_i32_0 = arith.constant 0 : i32
    %c0_i32_1 = arith.constant 0 : i32
    return %c0_i32, %c0_i32_0 : i32, i32
  }
  func.func @transform_6(%arg0: i32) -> (i32, i32) {
    %c0_i32 = arith.constant 0 : i32
    %c0_i32_0 = arith.constant 0 : i32
    %c0_i32_1 = arith.constant 0 : i32
    return %c0_i32, %c0_i32_0 : i32, i32
  }
  func.func @transform_7(%arg0: i32) -> (i32, i32) {
    %c0_i32 = arith.constant 0 : i32
    %c0_i32_0 = arith.constant 0 : i32
    %c0_i32_1 = arith.constant 0 : i32
    return %c0_i32, %c0_i32_0 : i32, i32
  }
  func.func @transform_8(%arg0: i32) -> (i32, i32) {
    %c0_i32 = arith.constant 0 : i32
    %c0_i32_0 = arith.constant 0 : i32
    %c0_i32_1 = arith.constant 0 : i32
    return %c0_i32, %c0_i32_0 : i32, i32
  }
  func.func @transform_9(%arg0: i32) -> (i32, i32) {
    %c0_i32 = arith.constant 0 : i32
    %c0_i32_0 = arith.constant 0 : i32
    return %arg0, %c0_i32 : i32, i32
  }
}

</mosaic_0001>

<bundles_post_ra>
// kernel: tpu_custom_call.1
= control target key start
LH: loop header
LB: loop body
LE: loop exit
PB: predicated region body
PF: predicated region fallthrough
CT: control target
= control target key end

     0   :  { %7 = vsyncpa [#allocation3], 0  ;;  %s633_s0 = inlined_call_operand.hbm [shape: f32[16,128], index: 0, kind: input, shape index: {}]   ;;  %s634_s1 = inlined_call_operand.hbm [shape: f32[8,128], index: 1, kind: input, shape index: {}]   ;;  %s635_s2 = inlined_call_operand.hbm [shape: f32[16,128], index: 2, kind: output, shape index: {}]  }
   0x1   :  { %9 = vsyncpa [#allocation3 + $0x1], 0 }
   0x2   :  { %10 = vsyncpa [#allocation6], 0 }
   0x3   :  { %11 = vsyncpa [#allocation4], 0 }
   0x4   :  { %13 = vsyncpa [#allocation4 + $0x1], 0  ;;  %s495_s9 = smov 0   ;;  %s497_s10 = smov 0  }
   0x5   :  { %s499_s11 = smov 0   ;;  %s501_s12 = smov 0  }
   0x6 LB: > { %s516_s13 = sadd.s32 4294967295, %s477_s12   ;;  %s276_s14 = sadd.s32 4294967294, %s477_s12   ;;  %s477_s12 = sphi %s501_s12, %s645_s12   ;;  %s473_s11 = sphi %s499_s11, %s644_s11   ;;  %s469_s10 = sphi %s497_s10, %s643_s10   ;;  %s465_s9 = sphi %s495_s9, %s642_s9  }
   0x7   : > { %p39_p0 = scmp.ne.s32.totalorder %s469_s10, %s465_s9  ;;  %p40_p1 = scmp.eq.s32.totalorder %s516_s13, 0 }
   0x8   : > { %p84_p2 = scmp.eq.s32.totalorder %s516_s13, 1  ;;  %p90_p3 = scmp.eq.s32.totalorder %s276_s14, 1 }
   0x9   : > { %p525_p4 = por %p40_p1, %p39_p0  ;;  %p277_p5 = scmp.ge.s32.totalorder %s477_s12, 1 }
   0xa   : > { %p530_p6 = por %p90_p3, %p39_p0  ;;  %p97_p7 = scmp.lt.s32.totalorder %s477_s12, 3 }
   0xb   : > { %s109_s19 = sshll.u32 %s634_s1, 4  ;;  %s479_s21 = smov [#allocation5]   ;;  %s110_s19 = int_to_ptr.hbm [resolvable:$true] %s109_s19 }
   0xc   : > { %p538_p8 = pnand %p277_p5, %p97_p7  ;;  %s111_s22 = sshll.u32 %s479_s21, 4  ;;  %s112_s22 = int_to_ptr.vmem [resolvable:$true] %s111_s22 }
   0xd   : > { %s548_s23 = sadd.s32 1, %s477_s12   ;;  %s26_s24 = sadd.s32 1, %s473_s11 }
   0xe   : > { %p298_p10 = pneg %p538_p8  ;;  %s23_s25 = ssub.s32 %s477_s12, %s548_s23 }
   0xf   : > { %p24_p12 = scmp.eq.s32.totalorder %s23_s25, 0  ;;  %p33_p13 = scmp.ne.s32.totalorder %s473_s11, %s469_s10 }
  0x10   : > { %p299_p11 = pnand %p298_p10, %p40_p1  ;;  %p34_p0 = scmp.eq.s32.totalorder %s477_s12, 0 }
  0x11   : > { %s557_s26 = scalar_select %p24_p12, %s473_s11, %s26_s24  }
  0x12   : > { %301 = dma.hbm_to_vmem [thread:$0]  (!%p299_p11), %s110_s19, 128, %s112_s22, [#allocation6]  }
  0x13   : > { %p561_p3 = por %p84_p2, %p33_p13  ;;  %p311_p5 = scmp.lt.s32.totalorder %s477_s12, 2 }
  0x14   : > { %s122_s28 = sand.u32 1, %s473_s11   ;;  %s281_s29 = sshll.u32 %s477_s12, 3 }
  0x15   : > { %p35_p7 = por %p34_p0, %p33_p13  ;;  %s280_s30 = sshll.u32 %s122_s28, 3 }
  0x16   : > { %s130_s5 = scalar_lea.hbm %s633_s0, %s281_s29  ;;  %s126_s7 = scalar_lea.vmem [#allocation2], %s280_s30 }
  0x17   : > { %s132_s6 = sshll.u32 %s130_s5, 4  ;;  %s134_s8 = sshll.u32 %s126_s7, 4  ;;  %s133_s6 = int_to_ptr.hbm [resolvable:$true] %s132_s6  ;;  %s135_s8 = int_to_ptr.vmem [resolvable:$true] %s134_s8 }
  0x18   : > { %p571_p10 = pnand %p311_p5, %p35_p7  ;;  %s123_s17 = scalar_lea.sflag [#allocation3], %s122_s28 }
  0x19   : > { %s377_s18 = sshra.s32 %s133_s6, 4  ;;  %s384_s24 = scalar_lea.hbm %s633_s0, 16  ;;  %s378_s18 = int_to_ptr.hbm [resolvable:$true] %s377_s18 }
  0x1a   : > { %s379_s19 = scalar_lea.hbm %s378_s18, 8  ;;  %p381_p11 = pneg %p571_p10 }
  0x1b   : > { %p380_p2 = scmp.ne.s32.totalorder %s378_s18, %s379_s19  ;;  %p385_p0 = scmp.lt.s32.totalorder %s378_s18, %s633_s0 }
  0x1c   : > { %p386_p5 = scmp.lt.s32.totalorder %s384_s24, %s379_s19 }
  0x1d   : > { %p382_p12 = pnand %p381_p11, %p380_p2 }
  0x1e   : > { %p387_p7 = por %p386_p5, %p385_p0 }
  0x1f   : > { %p383_p13 = pneg %p382_p12 }
  0x21   : > { %p388_p9 = pnand %p387_p7, %p383_p13 }
  0x23   : > { %391 = shalt.err (!%p388_p9)
}
  0x24   : > { %305 = dma.hbm_to_vmem [thread:$0]  (!%p571_p10), %s133_s6, 128, %s135_s8, %s123_s17  }
  0x25   : > { %143 = sbr.rel (%p538_p8) target bundleno = 60 (0x3c), region = 28  ;;  %s588_s28 = sand.u32 (!%p538_p8), 1, %s469_s10  }
  0x26   : > { %s283_s30 = sshll.u32 (!%p538_p8), %s588_s28, 3  ;;  %s146_s3 = scalar_lea.sflag (!%p538_p8), [#allocation3], %s588_s28 }
  0x27   : > { %s149_s4 = scalar_lea.vmem (!%p538_p8), [#allocation2], %s283_s30 }
  0x2a   : > { %452 = dma.done.wait (%p525_p4), %s146_s3, 128  }
  0x2b   : > { %454 = vsyncadd (%p525_p4), %s146_s3, 4294967168 }
  0x2c   : > { %456 = dma.done.wait (%p40_p1), [#allocation6], 128  }
  0x2d   : > { %458 = vsyncadd (%p40_p1), [#allocation6], 4294967168  ;;  %s287_s20 = sshll.u32 %s516_s13, 3  ;;  %s175_s8 = scalar_lea.vmem [#allocation7], %s283_s30  ;;  %v176_v0 = vld [vmem:[%s149_s4] sm:$0xff]  ;;  %v177_v1 = vld [vmem:[#allocation5] sm:$0xff] }
  0x2e   : > { %s191_s7 = scalar_lea.hbm %s635_s2, %s287_s20  ;;  %s193_s14 = sshll.u32 %s175_s8, 4  ;;  %v178_v2 = vadd.f32 %v177_v1, %v176_v0  ;;  %s194_s14 = int_to_ptr.vmem [resolvable:$true] %s193_s14 }
  0x2f   : > { %s195_s17 = sshll.u32 %s191_s7, 4  ;;  %s181_s15 = scalar_lea.sflag [#allocation4], %s588_s28  ;;  %s196_s17 = int_to_ptr.hbm [resolvable:$true] %s195_s17 }
  0x30   : > { %179 = vst [vmem:[%s175_s8] sm:$0xff] %v178_v2  ;;  %s421_s18 = sshra.s32 %s196_s17, 4  ;;  %s427_s22 = scalar_lea.hbm %s635_s2, 16  ;;  %s422_s18 = int_to_ptr.hbm [resolvable:$true] %s421_s18 }
  0x31   : > { %s423_s19 = scalar_lea.hbm %s422_s18, 8  ;;  %p428_p9 = scmp.lt.s32.totalorder %s422_s18, %s635_s2 }
  0x32   : > { %p424_p1 = scmp.ne.s32.totalorder %s422_s18, %s423_s19  ;;  %p429_p10 = scmp.lt.s32.totalorder %s427_s22, %s423_s19 }
  0x34   : > { %p425_p4 = pnand %p424_p1, %p561_p3  ;;  %p430_p2 = por %p429_p10, %p428_p9 }
  0x36   : > { %p426_p8 = pneg %p425_p4 }
  0x38   : > { %p431_p11 = pnand %p430_p2, %p426_p8 }
  0x3a   : > { %434 = shalt.err (!%p431_p11)
}
  0x3b   : > { %296 = dma.vmem_to_hbm [thread:$0]  (%p561_p3), %s194_s14, 128, %s196_s17, %s181_s15  }
  0x3c PF: > { %s207_s29 = sand.u32 1, %s465_s9   ;;  %p641_p12 = scmp.ge.s32.totalorder %s477_s12, 2 }
  0x3d   : > { %s208_s28 = scalar_lea.sflag [#allocation4], %s207_s29 }
  0x3e   : > { %p307_p13 = pnand %p641_p12, %p530_p6 }
  0x40   : > { %p308_p0 = pneg %p307_p13 }
  0x42   : > { %460 = dma.done.wait (%p308_p0), %s208_s28, 128  }
  0x43   : > { %462 = vsyncadd (%p308_p0), %s208_s28, 4294967168  ;;  %p16_p5 = scmp.ge.s32.totalorder %s548_s23, 4   ;;  %s642_s9 = smov %s469_s10 }
  0x44   : > { %s643_s10 = smov %s473_s11  ;;  %s644_s11 = smov %s557_s26 }
  0x45   : > { %s645_s12 = smov %s548_s23  ;;  %18 = sbr.rel (!%p16_p5) target bundleno = 6 (0x6), region = 77 }
  0x4a   :  { %214 = vsyncpa [#allocation3], 1 }
  0x4b   :  { %216 = vsyncpa [#allocation3 + $0x1], 1 }
  0x4c   :  { %217 = vsyncpa [#allocation6], 1 }
  0x4d   :  { %218 = vsyncpa [#allocation4], 1 }
  0x4e   :  { %220 = vsyncpa [#allocation4 + $0x1], 1 }

// kernel: tpu_custom_call.1
= control target key start
LH: loop header
LB: loop body
LE: loop exit
PB: predicated region body
PF: predicated region fallthrough
CT: control target
= control target key end

     0   :  { %vm38_vm0 = vcmask 261120   ;;  %s508_s0 = inlined_call_operand.vmem [shape: f32[16,32], index: 0, kind: input, shape index: {}]   ;;  %s509_s1 = inlined_call_operand.vmem [shape: f32[1,32], index: 1, kind: input, shape index: {}]   ;;  %s510_s2 = inlined_call_operand.vmem [shape: f32[1,32], index: 2, kind: input, shape index: {}]   ;;  %s511_s3 = inlined_call_operand.vmem [shape: bf16[32,128], index: 3, kind: input, shape index: {}]   ;;  %s512_s4 = inlined_call_operand.vmem [shape: f32[1,128], index: 4, kind: input, shape index: {}]   ;;  %s513_s5 = inlined_call_operand.vmem [shape: bf16[128,32], index: 5, kind: input, shape index: {}]   ;;  %s514_s6 = inlined_call_operand.vmem [shape: f32[1,32], index: 6, kind: input, shape index: {}]   ;;  %s515_s7 = inlined_call_operand.vmem [shape: f32[1,32], index: 7, kind: input, shape index: {}]   ;;  %s516_s8 = inlined_call_operand.vmem [shape: f32[1,32], index: 8, kind: input, shape index: {}]   ;;  %s517_s9 = inlined_call_operand.hbm [shape: f32[16,32], index: 9, kind: output, shape index: {}]  }
   0x1   :  { %v443_v0 = vld [vmem:[%s508_s0] sm:$0xff] }
   0x2   :  { %v39_v1 = vsel %vm38_vm0, %v443_v0, 0.0 }
   0x3   :  { %40 = vadd.xlane.f32.xlu0 %v39_v1 }
   0x4   :  { %14 = vsyncpa [#allocation3], 0  ;;  %v450_v2 = vld [vmem:[%s508_s0 + $0x8] sm:$0xff]  ;;  %v386_v4 = vmov 32.0   ;;  %v328_v23 = vld [vmem:[%s511_s3] sm:$0xff]  ;;  %s387_s12 = smov [#allocation2]  }
   0x5   :  { %v42_v3 = vsel %vm38_vm0, %v450_v2, 0.0  ;;  %346 = vrcp.f32 %v386_v4  ;;  %v329_v21 = vld [vmem:[%s511_s3 + $0x8] sm:$0xff]  ;;  %v342_v42 = vld [vmem:[%s509_s1] ss:$0 sm:$0xff]  ;;  %v337_v52 = vld [vmem:[%s513_s5 + $0x38] sm:$0xff]  ;;  %s271_s0 = sshll.u32 %s387_s12, 4  ;;  %s272_s0 = int_to_ptr.vmem [resolvable:$true] %s271_s0 }
   0x6   :  { %130 = vmatpush.bf16.msra.mxu0 %v329_v21  ;;  %v343_v47 = vld [vmem:[%s510_s2] ss:$0 sm:$0xff]  ;;  %247 = vmatpush.bf16.msra.mxu1 %v337_v52  ;;  %v336_v53 = vld [vmem:[%s513_s5 + $0x30] sm:$0xff]  ;;  %v335_v54 = vld [vmem:[%s513_s5 + $0x28] sm:$0xff]  ;;  %s273_s13 = sshll.u32 %s517_s9, 4  ;;  %s389_s3 = smov 8   ;;  %s274_s13 = int_to_ptr.hbm [resolvable:$true] %s273_s13 }
   0x7   :  { %v334_v55 = vld [vmem:[%s513_s5 + $0x20] sm:$0xff]  ;;  %v333_v56 = vld [vmem:[%s513_s5 + $0x18] sm:$0xff]  ;;  %v332_v58 = vld [vmem:[%s513_s5 + $0x10] sm:$0xff] }
   0x8   :  { %v344_v57 = vld [vmem:[%s512_s4] ss:$0 sm:$0xff]  ;;  %v331_v61 = vld [vmem:[%s513_s5 + $0x8] sm:$0xff] }
   0x9   :  { %v330_v63 = vld [vmem:[%s513_s5] sm:$0xff] }
   0xa   :  { %131 = vmatpush.bf16.msra.mxu0 %v328_v23  ;;  %248 = vmatpush.bf16.msra.mxu1 %v336_v53 }
   0xb   :  { %43 = vadd.xlane.f32.xlu0 %v42_v3  ;;  %v347_v5 = vpop.eup %346 }
   0xc   :  { %v46_v6 = vmul.f32 32.0, %v347_v5  ;;  %vm50_vm1 = vweird.f32 %v347_v5 }
   0xe   :  { %v47_v7 = vsub.f32 1.0, %v46_v6  ;;  %249 = vmatpush.bf16.msra.mxu1 %v335_v54 }
  0x10   :  { %v48_v8 = vmul.f32 %v347_v5, %v47_v7 }
  0x12   :  { %v49_v9 = vadd.f32 %v347_v5, %v48_v8  ;;  %250 = vmatpush.bf16.msra.mxu1 %v334_v55 }
  0x14   :  { %v51_v10 = vsel %vm50_vm1, %v347_v5, %v49_v9 }
  0x16   :  { %251 = vmatpush.bf16.msra.mxu1 %v333_v56 }
  0x1a   :  { %252 = vmatpush.bf16.msra.mxu1 %v332_v58 }
  0x1e   :  { %253 = vmatpush.bf16.msra.mxu1 %v331_v61 }
  0x22   :  { %254 = vmatpush.bf16.msra.mxu1 %v330_v63 }
  0x76   :  { %v41_v11 = vpop.xlane.xlu0 %40 }
  0x77   :  { %v52_v12 = vmul.f32 %v51_v10, %v41_v11 }
  0x79   :  { %v54_v13 = vsub.f32 %v443_v0, %v52_v12 }
  0x7b   :  { %v56_v14 = vmul.f32 %v54_v13, %v54_v13 }
  0x7d   :  { %v58_v15 = vsel %vm38_vm0, %v56_v14, 0.0 }
  0x7e   :  { %59 = vadd.xlane.f32.xlu1 %v58_v15  ;;  %v44_v16 = vpop.xlane.xlu0 %43 }
  0x7f   :  { %v53_v17 = vmul.f32 %v51_v10, %v44_v16 }
  0x81   :  { %v55_v18 = vsub.f32 %v450_v2, %v53_v17 }
  0x83   :  { %v57_v19 = vmul.f32 %v55_v18, %v55_v18 }
  0x85   :  { %v61_v20 = vsel %vm38_vm0, %v57_v19, 0.0 }
  0x86   :  { %62 = vadd.xlane.f32.xlu1 %v61_v20 }
  0xf1   :  { %v60_v22 = vpop.xlane.xlu1 %59 }
  0xf2   :  { %v64_v24 = vmul.f32 %v60_v22, %v51_v10 }
  0xf4   :  { %v66_v25 = vadd.f32 1e-05, %v64_v24 }
  0xf6   :  { %348 = vrsqrt.f32 %v66_v25  ;;  %vm74_vm3 = vweird.f32 %v66_v25 }
  0xf9   :  { %v63_v26 = vpop.xlane.xlu1 %62 }
  0xfa   :  { %v65_v27 = vmul.f32 %v63_v26, %v51_v10 }
  0xfc   :  { %v349_v28 = vpop.eup %348  ;;  %v67_v29 = vadd.f32 1e-05, %v65_v27 }
  0xfd   :  { %v69_v30 = vmul.f32 %v349_v28, %v66_v25  ;;  %vm75_vm2 = vweird.f32 %v349_v28 }
  0xfe   :  { %350 = vrsqrt.f32 %v67_v29  ;;  %vm76_vm4 = vmor %vm74_vm3, %vm75_vm2  ;;  %vm84_vm6 = vweird.f32 %v67_v29 }
  0xff   :  { %v70_v31 = vmul.f32 %v349_v28, %v69_v30 }
 0x101   :  { %v71_v32 = vmul.f32 0.5, %v70_v31 }
 0x103   :  { %v72_v33 = vsub.f32 1.5, %v71_v32  ;;  %v345_v32 = vld [vmem:[%s514_s6] ss:$0 sm:$0xff]  ;;  %s388_s6 = smov 128  }
 0x104   :  { %v351_v34 = vpop.eup %350 }
 0x105   :  { %v73_v35 = vmul.f32 %v349_v28, %v72_v33  ;;  %v79_v36 = vmul.f32 %v351_v34, %v67_v29  ;;  %vm85_vm5 = vweird.f32 %v351_v34 }
 0x106   :  { %vm86_vm7 = vmor %vm84_vm6, %vm85_vm5 }
 0x107   :  { %v80_v37 = vmul.f32 %v351_v34, %v79_v36  ;;  %v77_v38 = vsel %vm76_vm4, %v349_v28, %v73_v35 }
 0x108   :  { %v88_v41 = vmul.f32 %v77_v38, %v54_v13 }
 0x109   :  { %v81_v39 = vmul.f32 0.5, %v80_v37 }
 0x10a   :  { %v93_v46 = vmul.f32 %v342_v42, %v88_v41 }
 0x10b   :  { %v82_v40 = vsub.f32 1.5, %v81_v39 }
 0x10c   :  { %v98_v49 = vadd.f32 %v343_v47, %v93_v46 }
 0x10d   :  { %v83_v43 = vmul.f32 %v351_v34, %v82_v40 }
 0x10f   :  { %v87_v44 = vsel %vm86_vm7, %v351_v34, %v83_v43 }
 0x110   :  { %v89_v45 = vmul.f32 %v87_v44, %v55_v18 }
 0x112   :  { %v94_v48 = vmul.f32 %v342_v42, %v89_v45 }
 0x114   :  { %v99_v50 = vadd.f32 %v343_v47, %v94_v48 }
 0x116   :  { %v100_v51 = vpack.c.bf16 %v99_v50, %v98_v49 }
 0x118   :  { %293 = vmatmul.msk.bf16.vlgmr.msra.gmra.mxu0 %vm38_vm0, %v100_v51 }
 0x195   :  { %v133_v59 = vpop.f32.mrf.mxu0 }
 0x196   :  { %v134_v60 = vadd.f32 %v344_v57, %v133_v59 }
 0x198   :  { %v294_v62 = vmul.f32 -1.442695, %v134_v60 }
 0x19a   :  { %352 = vpow2.f32 %v294_v62 }
 0x19d   :  { %v135_v1 = vpop.f32.mrf.mxu0 }
 0x19e   :  { %v136_v3 = vadd.f32 %v344_v57, %v135_v1 }
 0x1a0   :  { %v353_v4 = vpop.eup %352  ;;  %v295_v5 = vmul.f32 -1.442695, %v136_v3 }
 0x1a1   :  { %v144_v6 = vadd.f32 1.0, %v353_v4 }
 0x1a2   :  { %354 = vpow2.f32 %v295_v5 }
 0x1a3   :  { %356 = vrcp.f32 %v144_v6  ;;  %v157_v16 = vand.u32 2147483648, %v144_v6  ;;  %vm151_vm9 = vweird.f32 %v144_v6  ;;  %v155_v17 = vand.u32 2147483647, %v144_v6 }
 0x1a5   :  { %v158_v23 = vor.u32 1.1754944e-38, %v157_v16  ;;  %vm156_vm12 = vcmp.eq.f32.partialorder %v155_v17, 8.507059e+37 }
 0x1a8   :  { %v355_v7 = vpop.eup %354 }
 0x1a9   :  { %v357_v8 = vpop.eup %356  ;;  %v145_v9 = vadd.f32 1.0, %v355_v7 }
 0x1aa   :  { %v147_v10 = vmul.f32 %v357_v8, %v144_v6  ;;  %vm152_vm8 = vweird.f32 %v357_v8 }
 0x1ab   :  { %358 = vrcp.f32 %v145_v9  ;;  %vm153_vm10 = vmor %vm151_vm9, %vm152_vm8  ;;  %v172_v19 = vand.u32 2147483648, %v145_v9  ;;  %v170_v22 = vand.u32 2147483647, %v145_v9  ;;  %vm166_vm13 = vweird.f32 %v145_v9 }
 0x1ac   :  { %v148_v11 = vsub.f32 1.0, %v147_v10 }
 0x1ad   :  { %v173_v26 = vor.u32 1.1754944e-38, %v172_v19  ;;  %vm171_vm15 = vcmp.eq.f32.partialorder %v170_v22, 8.507059e+37 }
 0x1ae   :  { %v149_v12 = vmul.f32 %v357_v8, %v148_v11 }
 0x1b0   :  { %v150_v14 = vadd.f32 %v357_v8, %v149_v12 }
 0x1b1   :  { %v359_v13 = vpop.eup %358 }
 0x1b2   :  { %v162_v15 = vmul.f32 %v359_v13, %v145_v9  ;;  %v154_v20 = vsel %vm153_vm10, %v357_v8, %v150_v14  ;;  %vm167_vm11 = vweird.f32 %v359_v13 }
 0x1b3   :  { %v159_v25 = vsel %vm156_vm12, %v158_v23, %v154_v20  ;;  %vm168_vm14 = vmor %vm166_vm13, %vm167_vm11 }
 0x1b4   :  { %v163_v18 = vsub.f32 1.0, %v162_v15  ;;  %v176_v29 = vmul.f32 %v159_v25, %v134_v60 }
 0x1b6   :  { %v164_v21 = vmul.f32 %v359_v13, %v163_v18 }
 0x1b8   :  { %v165_v24 = vadd.f32 %v359_v13, %v164_v21 }
 0x1ba   :  { %v169_v27 = vsel %vm168_vm14, %v359_v13, %v165_v24 }
 0x1bb   :  { %v174_v28 = vsel %vm171_vm15, %v173_v26, %v169_v27 }
 0x1bc   :  { %v177_v30 = vmul.f32 %v174_v28, %v136_v3 }
 0x1be   :  { %v178_v31 = vpack.c.bf16 %v177_v30, %v176_v29 }
 0x1c0   :  { %255 = vmatmul.bf16.vlgmr.msra.gmra.mxu1 %v178_v31 }
 0x23d   :  { %v256_v33 = vpop.f32.mrf.mxu1 }
 0x23e   :  { %v257_v34 = vadd.f32 %v345_v32, %v256_v33 }
 0x240   :  { %v261_v35 = vmul.f32 0.5, %v257_v34 }
 0x242   :  { %v263_v36 = vadd.f32 %v261_v35, %v443_v0 }
 0x244   :  { %265 = vst.msk [vmem:[#allocation2] sm:$0xff] %vm38_vm0, %v263_v36 }
 0x245   :  { %v258_v37 = vpop.f32.mrf.mxu1 }
 0x246   :  { %v259_v38 = vadd.f32 %v345_v32, %v258_v37 }
 0x248   :  { %v262_v39 = vmul.f32 0.5, %v259_v38 }
 0x24a   :  { %v264_v40 = vadd.f32 %v262_v39, %v450_v2 }
 0x24c   :  { %266 = vst.msk [vmem:[#allocation2 + $0x8] sm:$0xff] %vm38_vm0, %v264_v40 }
 0x24d   :  { %279 = dma.vmem_to_hbm [thread:$0]  %s272_s0, 256, %s274_s13, [#allocation3], %s388_s6, %s388_s6, %s389_s3  }
 0x24e   :  { %384 = dma.done.wait [#allocation3], 256  }
 0x24f   :  { %385 = vsyncadd [#allocation3], 4294967040 }
 0x250   :  { %284 = vsyncpa [#allocation3], 1 }

</bundles_post_ra>
